<compile_context>
chip_gen: v5e
topology: v5e:2x2
jax: 0.10.0
libtpu: 0.0.40
codegen_flags: <defaults>
</compile_context>

<pallas_src>
import functools

import jax
import jax.numpy as jnp
from jax.experimental import pallas as pl
from jax.experimental.pallas import tpu as pltpu

HIDDEN = 256
LANE = 128
SUBLANE = 8


def _sigmoid(z):
    # exp -> EUP; approximate reciprocal -> EUP vrcp (divide off the VALU slot).
    return pl.reciprocal(1.0 + jnp.exp(-z), approx=True)


def _mlp_act_head_kernel(x_ref, w1t_ref, b1_ref, w2t_ref, b2_ref, o_ref, *,
                         matmul_dtype):
    # x_ref:   (TB, D)
    # w1t_ref: (D, 256)     b1_ref: (1, 256)
    # w2t_ref: (256, Cp)    b2_ref: (1, Cp)     (Cp = num_caps padded to 128k)
    # o_ref:   (TB, Cp)
    x = x_ref[...].astype(matmul_dtype)
    w1t = w1t_ref[...].astype(matmul_dtype)
    h = jnp.dot(x, w1t, preferred_element_type=jnp.float32)
    # Bias add + sigmoid stay in f32 (v5e VPU/EUP has no bf16 path).
    h = _sigmoid(h + b1_ref[...])

    w2t = w2t_ref[...].astype(matmul_dtype)
    y = jnp.dot(h.astype(matmul_dtype), w2t, preferred_element_type=jnp.float32)
    y = _sigmoid(y + b2_ref[...])
    o_ref[...] = y.astype(o_ref.dtype)


def prepare_params(w1, b1, w2, b2):
    """One-time parameter preprocessing (NOT per call):
      - transpose weights so the kernel runs plain row-major MXU matmuls,
      - pad num_caps up to a multiple of 128 so output stores are lane-dense.
    w1: (256, D), b1: (256,), w2: (num_caps, 256), b2: (num_caps,)."""
    num_caps, hidden = w2.shape
    assert hidden == HIDDEN
    c_pad = max(LANE, ((num_caps + LANE - 1) // LANE) * LANE)

    w1t = jnp.transpose(jnp.asarray(w1))                       # (D, 256)
    b1r = jnp.asarray(b1).reshape(1, HIDDEN)                   # (1, 256)
    w2t = jnp.zeros((HIDDEN, c_pad), w2.dtype).at[:, :num_caps].set(
        jnp.transpose(jnp.asarray(w2)))                        # (256, Cp)
    b2r = jnp.zeros((1, c_pad), b2.dtype).at[:, :num_caps].set(
        jnp.asarray(b2).reshape(1, -1))                        # (1, Cp)
    return dict(w1t=w1t, b1=b1r, w2t=w2t, b2=b2r, num_caps=num_caps)


def _pick_batch_tile(B, D, c_pad, x_bytes, out_bytes, vmem_budget_bytes):
    # Resident (single-buffered) weights + biases, f32.
    resident = (D * HIDDEN + HIDDEN * c_pad + HIDDEN + c_pad) * 4
    # Per batch row: double-buffered x tile + double-buffered out tile + the
    # f32 hidden intermediate.
    per_row = 2 * D * x_bytes + 2 * c_pad * out_bytes + HIDDEN * 4
    tb = (vmem_budget_bytes - resident) // max(per_row, 1)
    tb = int(max(SUBLANE, min(tb, 1024)))
    if tb >= B:
        return B                       # single block covering the full batch
    return max(SUBLANE, (tb // SUBLANE) * SUBLANE)


def mlp_activation_head(x, params, *, matmul_dtype=jnp.float32,
                        max_batch_tile=None, vmem_budget_bytes=24 << 20):
    """x: (B, input_dim). Returns (B, num_caps, 1)."""
    w1t, b1, w2t, b2 = params["w1t"], params["b1"], params["w2t"], params["b2"]
    num_caps = params["num_caps"]
    B, D = x.shape
    c_pad = w2t.shape[1]

    tb = _pick_batch_tile(B, D, c_pad, jnp.dtype(x.dtype).itemsize,
                          jnp.dtype(x.dtype).itemsize, vmem_budget_bytes)
    if max_batch_tile is not None:
        tb = min(tb, max_batch_tile)
    tb = min(tb, B)
    if tb < B:
        tb = max(SUBLANE, (tb // SUBLANE) * SUBLANE)
    grid = (pl.cdiv(B, tb),)

    kernel = functools.partial(_mlp_act_head_kernel, matmul_dtype=matmul_dtype)

    out = pl.pallas_call(
        kernel,
        out_shape=jax.ShapeDtypeStruct((B, c_pad), x.dtype),
        grid_spec=pltpu.PrefetchScalarGridSpec(
            num_scalar_prefetch=0,
            grid=grid,
            in_specs=[
                pl.BlockSpec((tb, D), lambda i: (i, 0)),        # batch-tiled x
                pl.BlockSpec((D, HIDDEN), lambda i: (0, 0)),    # resident w1^T
                pl.BlockSpec((1, HIDDEN), lambda i: (0, 0)),    # resident b1
                pl.BlockSpec((HIDDEN, c_pad), lambda i: (0, 0)),  # resident w2^T
                pl.BlockSpec((1, c_pad), lambda i: (0, 0)),     # resident b2
            ],
            out_specs=pl.BlockSpec((tb, c_pad), lambda i: (i, 0)),
        ),
        compiler_params=pltpu.CompilerParams(
            dimension_semantics=("parallel",),   # shard batch across v7x's 2 TCs
        ),
    )(x, w1t, b1, w2t, b2)

    # Drop lane padding, then unsqueeze(-1) -> (B, num_caps, 1).
    return out[:, :num_caps, None]


def _init_params(key, input_dim, num_caps):
    # Deterministic, nn.Linear-style uniform init (synthetic, not a checkpoint).
    k1, k2, k3, k4 = jax.random.split(key, 4)
    lim1 = 1.0 / jnp.sqrt(input_dim)
    lim2 = 1.0 / jnp.sqrt(HIDDEN)
    w1 = jax.random.uniform(k1, (HIDDEN, input_dim), jnp.float32, -lim1, lim1)
    b1 = jax.random.uniform(k2, (HIDDEN,), jnp.float32, -lim1, lim1)
    w2 = jax.random.uniform(k3, (num_caps, HIDDEN), jnp.float32, -lim2, lim2)
    b2 = jax.random.uniform(k4, (num_caps,), jnp.float32, -lim2, lim2)
    return w1, b1, w2, b2


if __name__ == "__main__":
    key = jax.random.PRNGKey(0)
    kx, kp = jax.random.split(key)

    B, INPUT_DIM, NUM_CAPS = 24, 32, 16
    x = jax.random.normal(kx, (B, INPUT_DIM), jnp.float32)
    w1, b1, w2, b2 = _init_params(kp, INPUT_DIM, NUM_CAPS)
    params = prepare_params(w1, b1, w2, b2)

    # Pure-JAX reference (matches the PyTorch forward).
    ref = jax.nn.sigmoid(jax.nn.sigmoid(x @ w1.T + b1) @ w2.T + b2)[..., None]

    # f32 MXU path (v5e-safe default); small TB to exercise a multi-step grid.
    # Tolerance covers the approximate EUP reciprocal in the sigmoid.
    y32 = jax.block_until_ready(
        mlp_activation_head(x, params, matmul_dtype=jnp.float32, max_batch_tile=8))
    assert y32.shape == (B, NUM_CAPS, 1)
    assert jnp.allclose(y32, ref, atol=2e-3, rtol=2e-3), \
        float(jnp.max(jnp.abs(y32 - ref)))

    # bf16 MXU operand path (v6e/v7x): f32 accumulation, looser tolerance.
    ybf = jax.block_until_ready(
        mlp_activation_head(x, params, matmul_dtype=jnp.bfloat16))
    assert ybf.shape == (B, NUM_CAPS, 1)
    assert jnp.allclose(ybf, ref, atol=3e-2, rtol=3e-2), \
        float(jnp.max(jnp.abs(ybf - ref)))

    print("KERNEL_OK")
</pallas_src>

<mosaic_0001>
module attributes {stable_mosaic.version = 11 : i64} {
  func.func @_mlp_act_head_kernel(%arg0: i32, %arg1: memref<8x32xf32, #tpu.memory_space<vmem>>, %arg2: memref<32x256xf32, #tpu.memory_space<vmem>>, %arg3: memref<1x256xf32, #tpu.memory_space<vmem>>, %arg4: memref<256x128xf32, #tpu.memory_space<vmem>>, %arg5: memref<1x128xf32, #tpu.memory_space<vmem>>, %arg6: memref<8x128xf32, #tpu.memory_space<vmem>>) attributes {dimension_semantics = [#tpu.dimension_semantics<parallel>], iteration_bounds = array<i64: 3>, scalar_prefetch = 0 : i64, scratch_operands = 0 : i64, tpu.core_type = #tpu.core_type<tc>, window_params = [{transform_indices = @transform_0, window_bounds = array<i64: 8, 32>}, {pipeline_mode = #tpu.pipeline_mode<synchronous>, transform_indices = @transform_1, window_bounds = array<i64: 32, 256>}, {pipeline_mode = #tpu.pipeline_mode<synchronous>, transform_indices = @transform_2, window_bounds = array<i64: 1, 256>}, {pipeline_mode = #tpu.pipeline_mode<synchronous>, transform_indices = @transform_3, window_bounds = array<i64: 256, 128>}, {pipeline_mode = #tpu.pipeline_mode<synchronous>, transform_indices = @transform_4, window_bounds = array<i64: 1, 128>}, {transform_indices = @transform_5, window_bounds = array<i64: 8, 128>}]} {
    %c0 = arith.constant 0 : index
    %c0_0 = arith.constant 0 : index
    %0 = vector.load %arg1[%c0, %c0_0] : memref<8x32xf32, #tpu.memory_space<vmem>>, vector<8x32xf32>
    %c0_1 = arith.constant 0 : index
    %c0_2 = arith.constant 0 : index
    %1 = vector.load %arg2[%c0_1, %c0_2] : memref<32x256xf32, #tpu.memory_space<vmem>>, vector<32x256xf32>
    %cst = arith.constant dense<0.000000e+00> : vector<8x256xf32>
    %2 = tpu.matmul %0, %1, %cst {dimension_numbers = #tpu.dot_dimension_numbers<[1], [0], [0], [1], [0, 0, 1, 1], [], []>} : vector<8x32xf32>, vector<32x256xf32>, vector<8x256xf32> -> vector<8x256xf32>
    %c0_3 = arith.constant 0 : index
    %c0_4 = arith.constant 0 : index
    %3 = vector.load %arg3[%c0_3, %c0_4] : memref<1x256xf32, #tpu.memory_space<vmem>>, vector<1x256xf32>
    %4 = vector.broadcast %3 : vector<1x256xf32> to vector<8x256xf32>
    %5 = arith.addf %2, %4 : vector<8x256xf32>
    %cst_5 = arith.constant 0.000000e+00 : f32
    %6 = vector.broadcast %cst_5 : f32 to vector<8x256xf32>
    %7 = arith.subf %6, %5 : vector<8x256xf32>
    %8 = math.exp %7 : vector<8x256xf32>
    %cst_6 = arith.constant 1.000000e+00 : f32
    %9 = vector.broadcast %cst_6 : f32 to vector<8x256xf32>
    %10 = arith.addf %9, %8 : vector<8x256xf32>
    %11 = tpu.reciprocal %10 {approx = true} : vector<8x256xf32> -> vector<8x256xf32>
    %c0_7 = arith.constant 0 : index
    %c0_8 = arith.constant 0 : index
    %12 = vector.load %arg4[%c0_7, %c0_8] : memref<256x128xf32, #tpu.memory_space<vmem>>, vector<256x128xf32>
    %cst_9 = arith.constant dense<0.000000e+00> : vector<8x128xf32>
    %13 = tpu.matmul %11, %12, %cst_9 {dimension_numbers = #tpu.dot_dimension_numbers<[1], [0], [0], [1], [0, 0, 1, 1], [], []>} : vector<8x256xf32>, vector<256x128xf32>, vector<8x128xf32> -> vector<8x128xf32>
    %c0_10 = arith.constant 0 : index
    %c0_11 = arith.constant 0 : index
    %14 = vector.load %arg5[%c0_10, %c0_11] : memref<1x128xf32, #tpu.memory_space<vmem>>, vector<1x128xf32>
    %15 = vector.broadcast %14 : vector<1x128xf32> to vector<8x128xf32>
    %16 = arith.addf %13, %15 : vector<8x128xf32>
    %cst_12 = arith.constant 0.000000e+00 : f32
    %17 = vector.broadcast %cst_12 : f32 to vector<8x128xf32>
    %18 = arith.subf %17, %16 : vector<8x128xf32>
    %19 = math.exp %18 : vector<8x128xf32>
    %cst_13 = arith.constant 1.000000e+00 : f32
    %20 = vector.broadcast %cst_13 : f32 to vector<8x128xf32>
    %21 = arith.addf %20, %19 : vector<8x128xf32>
    %22 = tpu.reciprocal %21 {approx = true} : vector<8x128xf32> -> vector<8x128xf32>
    %c0_14 = arith.constant 0 : index
    %c0_15 = arith.constant 0 : index
    %23 = vector.load %arg6[%c0_14, %c0_15] : memref<8x128xf32, #tpu.memory_space<vmem>>, vector<8x128xf32>
    tpu.vector_store %arg6[%c0_14, %c0_15], %22 {strides = array<i32>} : memref<8x128xf32, #tpu.memory_space<vmem>>, vector<8x128xf32>,
    return
  }
  func.func @transform_0(%arg0: i32) -> (i32, i32) {
    %c0_i32 = arith.constant 0 : i32
    %c0_i32_0 = arith.constant 0 : i32
    return %arg0, %c0_i32 : i32, i32
  }
  func.func @transform_1(%arg0: i32) -> (i32, i32) {
    %c0_i32 = arith.constant 0 : i32
    %c0_i32_0 = arith.constant 0 : i32
    %c0_i32_1 = arith.constant 0 : i32
    return %c0_i32, %c0_i32_0 : i32, i32
  }
  func.func @transform_2(%arg0: i32) -> (i32, i32) {
    %c0_i32 = arith.constant 0 : i32
    %c0_i32_0 = arith.constant 0 : i32
    %c0_i32_1 = arith.constant 0 : i32
    return %c0_i32, %c0_i32_0 : i32, i32
  }
  func.func @transform_3(%arg0: i32) -> (i32, i32) {
    %c0_i32 = arith.constant 0 : i32
    %c0_i32_0 = arith.constant 0 : i32
    %c0_i32_1 = arith.constant 0 : i32
    return %c0_i32, %c0_i32_0 : i32, i32
  }
  func.func @transform_4(%arg0: i32) -> (i32, i32) {
    %c0_i32 = arith.constant 0 : i32
    %c0_i32_0 = arith.constant 0 : i32
    %c0_i32_1 = arith.constant 0 : i32
    return %c0_i32, %c0_i32_0 : i32, i32
  }
  func.func @transform_5(%arg0: i32) -> (i32, i32) {
    %c0_i32 = arith.constant 0 : i32
    %c0_i32_0 = arith.constant 0 : i32
    return %arg0, %c0_i32 : i32, i32
  }
}

</mosaic_0001>

<bundles_post_ra>
// kernel: tpu_custom_call.1
= control target key start
LH: loop header
LB: loop body
LE: loop exit
PB: predicated region body
PF: predicated region fallthrough
CT: control target
= control target key end

     0   :  { %10 = vsyncpa [#allocation3], 0  ;;  %s1064_s0 = inlined_call_operand.hbm [shape: f32[24,32], index: 0, kind: input, shape index: {}]   ;;  %s1065_s1 = inlined_call_operand.hbm [shape: f32[32,256], index: 1, kind: input, shape index: {}]   ;;  %s1066_s2 = inlined_call_operand.hbm [shape: f32[1,256], index: 2, kind: input, shape index: {}]   ;;  %s1067_s3 = inlined_call_operand.hbm [shape: f32[256,128], index: 3, kind: input, shape index: {}]   ;;  %s1068_s4 = inlined_call_operand.vmem [shape: f32[1,128], index: 4, kind: input, shape index: {}]   ;;  %s1069_s5 = inlined_call_operand.hbm [shape: f32[24,128], index: 5, kind: output, shape index: {}]  }
   0x1   :  { %12 = vsyncpa [#allocation3 + $0x1], 0 }
   0x2   :  { %13 = vsyncpa [#allocation6], 0 }
   0x3   :  { %14 = vsyncpa [#allocation9], 0 }
   0x4   :  { %15 = vsyncpa [#allocation4], 0 }
   0x5   :  { %17 = vsyncpa [#allocation4 + $0x1], 0  ;;  %s903_s18 = smov 0   ;;  %s905_s19 = smov 0  }
   0x6   :  { %s907_s20 = smov 0   ;;  %s909_s21 = smov 0  }
   0x7 LB: > { %s175_s24 = sshll.u32 %s1065_s1, 4  ;;  %s927_s25 = sadd.s32 4294967295, %s864_s21   ;;  %s864_s21 = sphi %s909_s21, %s1079_s21   ;;  %s860_s20 = sphi %s907_s20, %s1078_s20   ;;  %s856_s19 = sphi %s905_s19, %s1077_s19   ;;  %s852_s18 = sphi %s903_s18, %s1076_s18   ;;  %s176_s24 = int_to_ptr.hbm [resolvable:$true] %s175_s24 }
   0x8   : > { %p557_p0 = scmp.ge.s32.totalorder %s864_s21, 1  ;;  %p44_p1 = scmp.eq.s32.totalorder %s927_s25, 0 }
   0x9   : > { %p164_p2 = scmp.lt.s32.totalorder %s864_s21, 4  ;;  %s866_s27 = smov [#allocation5]  }
   0xa   : > { %s177_s28 = sshll.u32 %s866_s27, 4  ;;  %s190_s6 = sshll.u32 %s1066_s2, 4  ;;  %s178_s28 = int_to_ptr.vmem [resolvable:$true] %s177_s28  ;;  %s191_s6 = int_to_ptr.hbm [resolvable:$true] %s190_s6 }
   0xb   : > { %p932_p3 = pnand %p557_p0, %p164_p2  ;;  %s201_s10 = sshll.u32 %s1067_s3, 4  ;;  %s202_s10 = int_to_ptr.hbm [resolvable:$true] %s201_s10 }
   0xc   : > { %s867_s11 = smov [#allocation7]   ;;  %s868_s13 = smov 256  }
   0xd   : > { %p592_p4 = pneg %p932_p3  ;;  %s192_s12 = sshll.u32 %s867_s11, 4  ;;  %s193_s12 = int_to_ptr.vmem [resolvable:$true] %s192_s12 }
   0xe   : > { %s869_s14 = smov 16   ;;  %s870_s15 = smov [#allocation8]  }
   0xf   : > { %p943_p5 = pnand %p592_p4, %p44_p1  ;;  %s203_s16 = sshll.u32 %s870_s15, 4  ;;  %s204_s16 = int_to_ptr.vmem [resolvable:$true] %s203_s16 }
  0x10   : > { %s871_s17 = smov 128   ;;  %s872_s22 = smov 8  }
  0x11   : > { %595 = dma.hbm_to_vmem [thread:$0]  (!%p943_p5), %s176_s24, 1024, %s178_s28, [#allocation6], %s868_s13, %s868_s13, %s869_s14  }
  0x12   : > { %598 = dma.hbm_to_vmem [thread:$0]  (!%p943_p5), %s191_s6, 32, %s193_s12, [#allocation6]  }
  0x13   : > { %601 = dma.hbm_to_vmem [thread:$0]  (!%p943_p5), %s202_s10, 4096, %s204_s16, [#allocation9], %s871_s17, %s871_s17, %s872_s22  }
  0x14   : > { %s556_s23 = sadd.s32 4294967294, %s864_s21   ;;  %s958_s24 = sadd.s32 1, %s864_s21  }
  0x15   : > { %s30_s27 = sadd.s32 1, %s860_s20  ;;  %s27_s28 = ssub.s32 %s864_s21, %s958_s24 }
  0x16   : > { %p37_p6 = scmp.ne.s32.totalorder %s860_s20, %s856_s19  ;;  %p28_p7 = scmp.eq.s32.totalorder %s27_s28, 0 }
  0x17   : > { %p38_p8 = scmp.eq.s32.totalorder %s864_s21, 0  ;;  %p43_p9 = scmp.ne.s32.totalorder %s856_s19, %s852_s18 }
  0x18   : > { %p151_p10 = scmp.eq.s32.totalorder %s927_s25, 2  ;;  %p157_p13 = scmp.eq.s32.totalorder %s556_s23, 2 }
  0x19   : > { %s970_s29 = scalar_select %p28_p7, %s860_s20, %s30_s27  }
  0x1a   : > { %p974_p11 = por %p44_p1, %p43_p9  ;;  %p978_p12 = por %p151_p10, %p37_p6 }
  0x1b   : > { %p39_p0 = por %p38_p8, %p37_p6  ;;  %s220_s7 = sand.u32 1, %s860_s20  }
  0x1c   : > { %p983_p2 = por %p157_p13, %p43_p9  ;;  %p613_p4 = scmp.lt.s32.totalorder %s864_s21, 3 }
  0x1d   : > { %s562_s9 = sshll.u32 %s220_s7, 3  ;;  %s563_s10 = sshll.u32 %s864_s21, 3 }
  0x1e   : > { %s228_s13 = scalar_lea.hbm %s1064_s0, %s563_s10  ;;  %s224_s15 = scalar_lea.vmem [#allocation2], %s562_s9 }
  0x1f   : > { %s230_s14 = sshll.u32 %s228_s13, 4  ;;  %s232_s16 = sshll.u32 %s224_s15, 4  ;;  %s231_s14 = int_to_ptr.hbm [resolvable:$true] %s230_s14  ;;  %s233_s16 = int_to_ptr.vmem [resolvable:$true] %s232_s16 }
  0x20   : > { %p992_p5 = pnand %p613_p4, %p39_p0  ;;  %s221_s22 = scalar_lea.sflag [#allocation3], %s220_s7 }
  0x21   : > { %s760_s23 = sshra.s32 %s231_s14, 4  ;;  %s767_s9 = scalar_lea.hbm %s1064_s0, 24  ;;  %s761_s23 = int_to_ptr.hbm [resolvable:$true] %s760_s23 }
  0x22   : > { %s762_s27 = scalar_lea.hbm %s761_s23, 8  ;;  %p764_p7 = pneg %p992_p5 }
  0x23   : > { %p763_p6 = scmp.ne.s32.totalorder %s761_s23, %s762_s27  ;;  %p768_p10 = scmp.lt.s32.totalorder %s761_s23, %s1064_s0 }
  0x24   : > { %p769_p13 = scmp.lt.s32.totalorder %s767_s9, %s762_s27 }
  0x25   : > { %p765_p8 = pnand %p764_p7, %p763_p6 }
  0x26   : > { %p770_p0 = por %p769_p13, %p768_p10 }
  0x27   : > { %p766_p9 = pneg %p765_p8 }
  0x29   : > { %p771_p4 = pnand %p770_p0, %p766_p9 }
  0x2b   : > { %774 = shalt.err (!%p771_p4)
}
  0x2c   : > { %605 = dma.hbm_to_vmem [thread:$0]  (!%p992_p5), %s231_s14, 128, %s233_s16, %s221_s22  }
  0x2d   : > { %241 = sbr.rel (%p932_p3) target bundleno = 370 (0x172), region = 40  ;;  %s1009_s7 = sand.u32 (!%p932_p3), 1, %s856_s19  }
  0x2e   : > { %s565_s13 = sshll.u32 (!%p932_p3), %s1009_s7, 3  ;;  %s244_s15 = scalar_lea.sflag (!%p932_p3), [#allocation3], %s1009_s7 }
  0x2f   : > { %s247_s23 = scalar_lea.vmem (!%p932_p3), [#allocation2], %s565_s13 }
  0x32   : > { %835 = dma.done.wait (%p974_p11), %s244_s15, 128  }
  0x33   : > { %837 = vsyncadd (%p974_p11), %s244_s15, 4294967168 }
  0x34   : > { %839 = dma.done.wait (%p44_p1), [#allocation6], 1056  }
  0x35   : > { %841 = vsyncadd (%p44_p1), [#allocation6], 4294966240 }
  0x36   : > { %843 = dma.done.wait (%p44_p1), [#allocation9], 4096  }
  0x37   : > { %845 = vsyncadd (%p44_p1), [#allocation9], 4294963200  ;;  %v297_v0 = vld [vmem:[#allocation5 + $0x30] sm:$0xff]  ;;  %v295_v1 = vld [vmem:[#allocation5 + $0x20] sm:$0xff]  ;;  %vm305_vm0 = vcmask 261120   ;;  %s573_s14 = sshll.u32 %s927_s25, 3 }
  0x38   : > { %v298_v2 = vld [vmem:[#allocation5 + $0x38] sm:$0xff]  ;;  %321 = vmatpush.msra.mxu0 %v297_v0  ;;  %v296_v3 = vld [vmem:[#allocation5 + $0x28] sm:$0xff]  ;;  %v293_v4 = vld [vmem:[#allocation5 + $0x10] sm:$0xff]  ;;  %s452_s22 = scalar_lea.hbm %s1069_s5, %s573_s14  ;;  %s289_s27 = scalar_lea.vmem [#allocation10], %s565_s13 }
  0x39   : > { %341 = vmatpush.msra.mxu1 %v298_v2  ;;  %v294_v5 = vld [vmem:[#allocation5 + $0x18] sm:$0xff]  ;;  %v291_v9 = vld [vmem:[#allocation5] sm:$0xff]  ;;  %v292_v10 = vld [vmem:[#allocation5 + $0x8] sm:$0xff]  ;;  %s454_s28 = sshll.u32 %s289_s27, 4  ;;  %s456_s10 = sshll.u32 %s452_s22, 4  ;;  %s455_s28 = int_to_ptr.vmem [resolvable:$true] %s454_s28  ;;  %s457_s10 = int_to_ptr.hbm [resolvable:$true] %s456_s10 }
  0x3a   : > { %322 = vmatpush.msra.mxu0 %v295_v1  ;;  %v374_v6 = vld [vmem:[#allocation8 + $0x78] sm:$0xff]  ;;  %v373_v7 = vld [vmem:[#allocation8 + $0x70] sm:$0xff]  ;;  %v372_v13 = vld [vmem:[#allocation8 + $0x68] sm:$0xff]  ;;  %s442_s9 = scalar_lea.sflag [#allocation4], %s1009_s7  ;;  %s804_s11 = sshra.s32 %s457_s10, 4  ;;  %s805_s11 = int_to_ptr.hbm [resolvable:$true] %s804_s11 }
  0x3b   : > { %342 = vmatpush.msra.mxu1 %v296_v3  ;;  %v390_v8 = vld [vmem:[#allocation8 + $0xf8] sm:$0xff]  ;;  %395 = vmatpush.msra.mxu2 %v374_v6  ;;  %v389_v11 = vld [vmem:[#allocation8 + $0xf0] sm:$0xff]  ;;  %v388_v14 = vld [vmem:[#allocation8 + $0xe8] sm:$0xff]  ;;  %s806_s25 = scalar_lea.hbm %s805_s11, 8  ;;  %p811_p5 = scmp.lt.s32.totalorder %s805_s11, %s1069_s5 }
  0x3c   : > { %415 = vmatpush.msra.mxu3 %v390_v8  ;;  %323 = vmatpush.msra.mxu0 %v293_v4  ;;  %v290_v12 = vld [vmem:[%s247_s23] sm:$0xff]  ;;  %v371_v15 = vld [vmem:[#allocation8 + $0x60] sm:$0xff]  ;;  %v299_v41 = vld [vmem:[#allocation7] sm:$0x3]  ;;  %p807_p1 = scmp.ne.s32.totalorder %s805_s11, %s806_s25  ;;  %s810_s23 = scalar_lea.hbm %s1069_s5, 24 }
  0x3d   : > { %343 = vmatpush.msra.mxu1 %v294_v5  ;;  %396 = vmatpush.msra.mxu2 %v373_v7  ;;  %v370_v16 = vld [vmem:[#allocation8 + $0x58] sm:$0xff]  ;;  %v387_v17 = vld [vmem:[#allocation8 + $0xe0] sm:$0xff]  ;;  %v369_v18 = vld [vmem:[#allocation8 + $0x50] sm:$0xff]  ;;  %v301_v42 = vperm.slane %v299_v41, 0  ;;  %v302_v43 = vperm.slane %v299_v41, 1  ;;  %p812_p6 = scmp.lt.s32.totalorder %s810_s23, %s806_s25 }
  0x3e   : > { %416 = vmatpush.msra.mxu3 %v389_v11  ;;  %324 = vmatpush.msra.mxu0 %v291_v9  ;;  %v386_v19 = vld [vmem:[#allocation8 + $0xd8] sm:$0xff]  ;;  %v368_v20 = vld [vmem:[#allocation8 + $0x48] sm:$0xff]  ;;  %v385_v21 = vld [vmem:[#allocation8 + $0xd0] sm:$0xff]  ;;  %p808_p3 = pnand %p807_p1, %p978_p12 }
  0x3f   : > { %344 = vmatpush.msra.mxu1 %v292_v10  ;;  %570 = vmatmul.msk.f32.vlgmr.msra.gmra.mxu0 %vm305_vm0, %v290_v12  ;;  %v367_v22 = vld [vmem:[#allocation8 + $0x40] sm:$0xff]  ;;  %v384_v23 = vld [vmem:[#allocation8 + $0xc8] sm:$0xff]  ;;  %v366_v24 = vld [vmem:[#allocation8 + $0x38] sm:$0xff]  ;;  %p813_p7 = por %p812_p6, %p811_p5 }
  0x40   : > { %571 = vmatmul.msk.f32.vlgmr.msra.gmra.mxu1 %vm305_vm0, %v290_v12  ;;  %397 = vmatpush.msra.mxu2 %v372_v13  ;;  %v383_v25 = vld [vmem:[#allocation8 + $0xc0] sm:$0xff]  ;;  %v365_v26 = vld [vmem:[#allocation8 + $0x30] sm:$0xff]  ;;  %v382_v27 = vld [vmem:[#allocation8 + $0xb8] sm:$0xff]  ;;  %p809_p11 = pneg %p808_p3 }
  0x41   : > { %417 = vmatpush.msra.mxu3 %v388_v14  ;;  %v364_v28 = vld [vmem:[#allocation8 + $0x28] sm:$0xff]  ;;  %v381_v29 = vld [vmem:[#allocation8 + $0xb0] sm:$0xff]  ;;  %v363_v30 = vld [vmem:[#allocation8 + $0x20] sm:$0xff] }
  0x42   : > { %398 = vmatpush.msra.mxu2 %v371_v15  ;;  %v380_v31 = vld [vmem:[#allocation8 + $0xa8] sm:$0xff]  ;;  %v362_v32 = vld [vmem:[#allocation8 + $0x18] sm:$0xff]  ;;  %v379_v33 = vld [vmem:[#allocation8 + $0xa0] sm:$0xff]  ;;  %p814_p8 = pnand %p813_p7, %p809_p11 }
  0x43   : > { %418 = vmatpush.msra.mxu3 %v387_v17  ;;  %v361_v34 = vld [vmem:[#allocation8 + $0x10] sm:$0xff]  ;;  %v378_v35 = vld [vmem:[#allocation8 + $0x98] sm:$0xff]  ;;  %v360_v36 = vld [vmem:[#allocation8 + $0x8] sm:$0xff] }
  0x44   : > { %399 = vmatpush.msra.mxu2 %v370_v16  ;;  %v377_v37 = vld [vmem:[#allocation8 + $0x90] sm:$0xff]  ;;  %v359_v38 = vld [vmem:[#allocation8] sm:$0xff]  ;;  %v376_v39 = vld [vmem:[#allocation8 + $0x88] sm:$0xff] }
  0x45   : > { %419 = vmatpush.msra.mxu3 %v386_v19  ;;  %v375_v40 = vld [vmem:[#allocation8 + $0x80] sm:$0xff]  ;;  %v657_v58 = vld [vmem:[%s1068_s4] ss:$0 sm:$0xff] }
  0x46   : > { %400 = vmatpush.msra.mxu2 %v369_v18 }
  0x47   : > { %420 = vmatpush.msra.mxu3 %v385_v21 }
  0x48   : > { %401 = vmatpush.msra.mxu2 %v368_v20 }
  0x49   : > { %421 = vmatpush.msra.mxu3 %v384_v23 }
  0x4a   : > { %402 = vmatpush.msra.mxu2 %v367_v22 }
  0x4b   : > { %422 = vmatpush.msra.mxu3 %v383_v25 }
  0x4c   : > { %403 = vmatpush.msra.mxu2 %v366_v24 }
  0x4d   : > { %423 = vmatpush.msra.mxu3 %v382_v27 }
  0x4e   : > { %404 = vmatpush.msra.mxu2 %v365_v26 }
  0x4f   : > { %424 = vmatpush.msra.mxu3 %v381_v29 }
  0x50   : > { %405 = vmatpush.msra.mxu2 %v364_v28 }
  0x51   : > { %425 = vmatpush.msra.mxu3 %v380_v31 }
  0x52   : > { %406 = vmatpush.msra.mxu2 %v363_v30 }
  0x53   : > { %426 = vmatpush.msra.mxu3 %v379_v33 }
  0x54   : > { %407 = vmatpush.msra.mxu2 %v362_v32 }
  0x55   : > { %427 = vmatpush.msra.mxu3 %v378_v35 }
  0x56   : > { %408 = vmatpush.msra.mxu2 %v361_v34 }
  0x57   : > { %428 = vmatpush.msra.mxu3 %v377_v37 }
  0x58   : > { %409 = vmatpush.msra.mxu2 %v360_v36 }
  0x59   : > { %429 = vmatpush.msra.mxu3 %v376_v39 }
  0x5a   : > { %410 = vmatpush.msra.mxu2 %v359_v38 }
  0x5b   : > { %430 = vmatpush.msra.mxu3 %v375_v40 }
  0xbc   : > { %v326_v44 = vpop.f32.mrf.mxu0 }
  0xbd   : > { %v346_v45 = vpop.f32.mrf.mxu1  ;;  %v327_v46 = vadd.f32 %v326_v44, %v301_v42 }
  0xbe   : > { %v347_v47 = vadd.f32 %v346_v45, %v302_v43 }
  0xbf   : > { %v349_v48 = vsub.f32 0.0, %v327_v46 }
  0xc0   : > { %v350_v49 = vsub.f32 0.0, %v347_v47 }
  0xc1   : > { %v351_v50 = vmul.f32 1.442695, %v349_v48 }
  0xc2   : > { %v353_v51 = vmul.f32 1.442695, %v350_v49 }
  0xc3   : > { %658 = vpow2.f32 %v351_v50 }
  0xc4   : > { %660 = vpow2.f32 %v353_v51 }
  0xc9   : > { %v659_v52 = vpop.eup %658 }
  0xca   : > { %v661_v53 = vpop.eup %660  ;;  %v355_v54 = vadd.f32 1.0, %v659_v52 }
  0xcb   : > { %v356_v55 = vadd.f32 1.0, %v661_v53 }
  0xcc   : > { %662 = vrcp.f32 %v355_v54 }
  0xcd   : > { %664 = vrcp.f32 %v356_v55 }
  0xd2   : > { %v663_v56 = vpop.eup %662 }
  0xd3   : > { %v665_v57 = vpop.eup %664  ;;  %411 = vmatmul.f32.vlgmr.msra.gmra.mxu2 %v663_v56 }
  0xd4   : > { %431 = vmatmul.f32.vlgmr.msra.gmra.mxu3 %v665_v57 }
 0x156   : > { %v412_v59 = vpop.f32.mrf.mxu2 }
 0x157   : > { %v413_v60 = vadd.f32 %v657_v58, %v412_v59  ;;  %v432_v61 = vpop.f32.mrf.mxu3 }
 0x159   : > { %v433_v62 = vadd.f32 %v432_v61, %v413_v60 }
 0x15b   : > { %v435_v63 = vsub.f32 0.0, %v433_v62 }
 0x15d   : > { %v436_v0 = vmul.f32 1.442695, %v435_v63 }
 0x15f   : > { %666 = vpow2.f32 %v436_v0 }
 0x165   : > { %v667_v1 = vpop.eup %666 }
 0x166   : > { %v438_v2 = vadd.f32 1.0, %v667_v1 }
 0x168   : > { %668 = vrcp.f32 %v438_v2 }
 0x16e   : > { %v669_v3 = vpop.eup %668 }
 0x16f   : > { %440 = vst [vmem:[%s289_s27] sm:$0xff] %v669_v3 }
 0x170   : > { %817 = shalt.err (!%p814_p8)
}
 0x171   : > { %590 = dma.vmem_to_hbm [thread:$0]  (%p978_p12), %s455_s28, 128, %s457_s10, %s442_s9  }
 0x172 PF: > { %p617_p9 = scmp.ge.s32.totalorder %s864_s21, 2  ;;  %s468_s7 = sand.u32 1, %s852_s18  }
 0x173   : > { %s469_s30 = scalar_lea.sflag [#allocation4], %s468_s7 }
 0x174   : > { %p607_p10 = pnand %p617_p9, %p983_p2 }
 0x176   : > { %p608_p13 = pneg %p607_p10 }
 0x178   : > { %847 = dma.done.wait (%p608_p13), %s469_s30, 128  }
 0x179   : > { %849 = vsyncadd (%p608_p13), %s469_s30, 4294967168  ;;  %p20_p0 = scmp.ge.s32.totalorder %s958_s24, 5   ;;  %s1076_s18 = smov %s856_s19 }
 0x17a   : > { %s1077_s19 = smov %s860_s20  ;;  %s1078_s20 = smov %s970_s29 }
 0x17b   : > { %s1079_s21 = smov %s958_s24  ;;  %22 = sbr.rel (!%p20_p0) target bundleno = 7 (0x7), region = 97 }
 0x180   :  { %475 = vsyncpa [#allocation3], 1 }
 0x181   :  { %477 = vsyncpa [#allocation3 + $0x1], 1 }
 0x182   :  { %478 = vsyncpa [#allocation6], 1 }
 0x183   :  { %479 = vsyncpa [#allocation9], 1 }
 0x184   :  { %480 = vsyncpa [#allocation4], 1 }
 0x185   :  { %482 = vsyncpa [#allocation4 + $0x1], 1 }

</bundles_post_ra>
